<compile_context>
chip_gen: v7x
topology: tpu7x:2x2x1
jax: 0.10.0
libtpu: 0.0.40
codegen_flags: <defaults>
</compile_context>

<pallas_src>
import jax
import jax.numpy as jnp
from jax.experimental import pallas as pl
from jax.experimental.pallas import tpu as pltpu


def _make_kernel(neg_slope):
    def kernel(w_ref, col_ref, o_ref):
        # w_ref   : (Cout, k*k*Cin)        bf16, expand folded into centre tap
        # col_ref : (k*k*Cin, N*H_out*W_out) bf16 im2col slab (lane-dense)
        # o_ref   : (Cout, N*H_out*W_out)  f32 lane-dense output slab
        acc = jnp.dot(w_ref[...], col_ref[...],
                      preferred_element_type=jnp.float32)
        # LeakyReLU(0.2) == where(acc>=0, acc, 0.2*acc) for 0 < slope < 1.
        o_ref[...] = jnp.maximum(acc, neg_slope * acc)
    return kernel


def residual_hidden_layer(x_nchw, w_conv2, w_expand, *, k, s, p, neg_slope=0.2):
    """x_nchw: (N, Cin, H, W); w_conv2: (Cout, Cin, k, k); w_expand: (Cout, Cin, 1, 1)."""
    N, Cin, H, W = x_nchw.shape
    Cout = w_conv2.shape[0]
    H_out = (H + 2 * p - k) // s + 1
    W_out = (W + 2 * p - k) // s + 1
    He = (H - 1) // s + 1
    We = (W - 1) // s + 1
    # The module is only well-formed when conv2 and expand agree spatially;
    # this is also the precondition for folding expand into conv2's centre tap.
    assert (H_out, W_out) == (He, We), "conv2/expand spatial size mismatch"
    assert 0 <= p < k, "centre-tap fold requires p < k"

    HW = H_out * W_out
    KKC = k * k * Cin
    lim_h = s * (H_out - 1) + 1
    lim_w = s * (W_out - 1) + 1

    # --- wrapper-side im2col (lane-dense RHS slab) -------------------------
    x = x_nchw.astype(jnp.float32)
    xpad = jnp.pad(x, ((0, 0), (0, 0), (p, p), (p, p)))      # (N, Cin, Hp, Wp)
    patches = []
    for kh in range(k):
        for kw in range(k):
            sl = jax.lax.slice(
                xpad, (0, 0, kh, kw),
                (N, Cin, kh + lim_h, kw + lim_w), (1, 1, s, s)
            )                                                 # (N, Cin, H_out, W_out)
            patches.append(sl)
    col = jnp.stack(patches, axis=0)                          # (k*k, N, Cin, Ho, Wo)
    col = jnp.transpose(col, (0, 2, 1, 3, 4))                 # (k*k, Cin, N, Ho, Wo)
    col = col.reshape(KKC, N * HW)                            # rows: (kh,kw,cin)

    # --- weights: fold expand (1x1) into the centre tap, flatten -----------
    w = jnp.transpose(w_conv2, (2, 3, 0, 1)).astype(jnp.float32)   # (k,k,Cout,Cin)
    w = w.at[p, p].add(w_expand[:, :, 0, 0].astype(jnp.float32))
    w = jnp.transpose(w, (2, 0, 1, 3)).reshape(Cout, KKC)          # (Cout, k*k*Cin)

    # bf16 inputs (native MXU dtype, half the DMA bytes); f32 accumulation.
    w_bf = w.astype(jnp.bfloat16)
    col_bf = col.astype(jnp.bfloat16)

    kernel = _make_kernel(neg_slope)
    out_flat = pl.pallas_call(
        kernel,
        out_shape=jax.ShapeDtypeStruct((Cout, N * HW), jnp.float32),
        in_specs=[
            pl.BlockSpec(memory_space=pltpu.MemorySpace.VMEM),
            pl.BlockSpec(memory_space=pltpu.MemorySpace.VMEM),
        ],
        out_specs=pl.BlockSpec(memory_space=pltpu.MemorySpace.VMEM),
    )(w_bf, col_bf)

    # (Cout, N*HW) -> (N, Cout, H_out, W_out): tiny wrapper-side transpose.
    return jnp.transpose(out_flat.reshape(Cout, N, H_out, W_out), (1, 0, 2, 3))


def _reference(x_nchw, w_conv2, w_expand, *, k, s, p, neg_slope=0.2):
    """Pure-JAX reference (matches the effective PyTorch forward)."""
    conv2 = jax.lax.conv_general_dilated(
        x_nchw, w_conv2, (s, s), [(p, p), (p, p)],
        dimension_numbers=("NCHW", "OIHW", "NCHW"),
        precision=jax.lax.Precision.HIGHEST)
    exp = jax.lax.conv_general_dilated(
        x_nchw, w_expand, (s, s), [(0, 0), (0, 0)],
        dimension_numbers=("NCHW", "OIHW", "NCHW"),
        precision=jax.lax.Precision.HIGHEST)
    out = conv2 + exp
    return jnp.where(out >= 0, out, neg_slope * out)


if __name__ == "__main__":
    # Module hyperparameters: n_inp=4, n_otpt=8, k=3, s=1, p=1 (all bias=False).
    N, Cin, H, W = 2, 4, 16, 16
    Cout, k, s, p = 8, 3, 1, 1

    key = jax.random.PRNGKey(0)
    kx, k1, k2, k3 = jax.random.split(key, 4)
    x = jax.random.normal(kx, (N, Cin, H, W), dtype=jnp.float32)
    # conv1 weights exist in the module but are dead in forward (unused here).
    w_conv1 = 0.1 * jax.random.normal(k1, (Cin, Cin, k, k), dtype=jnp.float32)
    w_conv2 = 0.1 * jax.random.normal(k2, (Cout, Cin, k, k), dtype=jnp.float32)
    w_expand = 0.1 * jax.random.normal(k3, (Cout, Cin, 1, 1), dtype=jnp.float32)

    out = residual_hidden_layer(x, w_conv2, w_expand, k=k, s=s, p=p)
    out = jax.block_until_ready(out)

    ref = jax.block_until_ready(_reference(x, w_conv2, w_expand, k=k, s=s, p=p))
    assert out.shape == (N, Cout, H, W), out.shape
    assert jnp.allclose(out, ref, atol=1e-2, rtol=1e-2), (
        float(jnp.max(jnp.abs(out - ref))))

    print("KERNEL_OK")
</pallas_src>

<mosaic_0001>
module attributes {stable_mosaic.version = 11 : i64} {
  func.func @kernel(%arg0: memref<8x36xbf16, #tpu.memory_space<vmem>>, %arg1: memref<36x512xbf16, #tpu.memory_space<vmem>>, %arg2: memref<8x512xf32, #tpu.memory_space<vmem>>) attributes {dimension_semantics = [], scalar_prefetch = 0 : i64, scratch_operands = 0 : i64, tpu.core_type = #tpu.core_type<tc>} {
    %c0 = arith.constant 0 : index
    %c0_0 = arith.constant 0 : index
    %0 = vector.load %arg0[%c0, %c0_0] : memref<8x36xbf16, #tpu.memory_space<vmem>>, vector<8x36xbf16>
    %c0_1 = arith.constant 0 : index
    %c0_2 = arith.constant 0 : index
    %1 = vector.load %arg1[%c0_1, %c0_2] : memref<36x512xbf16, #tpu.memory_space<vmem>>, vector<36x512xbf16>
    %cst = arith.constant dense<0.000000e+00> : vector<8x512xf32>
    %2 = tpu.matmul %0, %1, %cst {dimension_numbers = #tpu.dot_dimension_numbers<[1], [0], [0], [1], [0, 0, 1, 1], [], []>} : vector<8x36xbf16>, vector<36x512xbf16>, vector<8x512xf32> -> vector<8x512xf32>
    %cst_3 = arith.constant 2.000000e-01 : f32
    %3 = vector.broadcast %cst_3 : f32 to vector<8x512xf32>
    %4 = arith.mulf %3, %2 : vector<8x512xf32>
    %5 = arith.maximumf %2, %4 : vector<8x512xf32>
    %c0_4 = arith.constant 0 : index
    %c0_5 = arith.constant 0 : index
    %6 = vector.load %arg2[%c0_4, %c0_5] : memref<8x512xf32, #tpu.memory_space<vmem>>, vector<8x512xf32>
    tpu.vector_store %arg2[%c0_4, %c0_5], %5 {strides = array<i32>} : memref<8x512xf32, #tpu.memory_space<vmem>>, vector<8x512xf32>,
    return
  }
}

</mosaic_0001>

<bundles_post_ra>
// kernel: tpu_custom_call.1
= control target key start
LH: loop header
LB: loop body
LE: loop exit
PB: predicated region body
PF: predicated region fallthrough
CT: control target
= control target key end

     0   :  { %7 = vsyncpa [#allocation3], 0  ;;  %s401_s0 = inlined_call_operand.hbm [shape: bf16[8,36], index: 0, kind: input, shape index: {}]   ;;  %s402_s1 = inlined_call_operand.hbm [shape: bf16[36,512], index: 1, kind: input, shape index: {}]   ;;  %s403_s2 = inlined_call_operand.hbm [shape: f32[8,512], index: 2, kind: output, shape index: {}]  }
   0x1   :  { %8 = vsyncpa [#allocation6], 0 }
   0x2   :  { %9 = vsyncpa [#allocation4], 0  ;;  %s337_s9 = smov [#allocation2]   ;;  %s338_s11 = smov [#allocation5]  }
   0x3   :  { %s16_s10 = sshll.u32 %s337_s9, 4  ;;  %s25_s12 = sshll.u32 %s338_s11, 4  ;;  %s17_s10 = int_to_ptr.vmem [resolvable:$true] %s16_s10  ;;  %s358_s12 = int_to_ptr.vmem [resolvable:$true] %s25_s12 }
   0x4   :  { %s265_s15 = scalar_lea.hbm %s401_s0, 64 }
   0x5   :  { %p266_p0 = scmp.ne.s32.totalorder %s401_s0, %s265_s15  ;;  %p269_p1 = scmp.lt.u32.totalorder %s265_s15, %s401_s0 }
   0x7   :  { %p271_p2 = pnand %p269_p1, %p266_p0 }
   0x9   :  { %274 = shalt.err (!%p271_p2)
}
   0xa   :  { %s275_s20 = scalar_lea.vmem %s17_s10, 64  ;;  %p280_p4 = scmp.lt.s32.totalorder %s17_s10, %s17_s10 }
   0xb   :  { %p276_p3 = scmp.ne.s32.totalorder %s17_s10, %s275_s20  ;;  %p281_p5 = scmp.lt.s32.totalorder %s275_s20, %s275_s20 }
   0xd   :  { %p282_p6 = por %p281_p5, %p280_p4 }
   0xf   :  { %p283_p7 = pnand %p282_p6, %p276_p3 }
  0x11   :  { %286 = shalt.err (!%p283_p7)
}
  0x12   :  { %19 = dma.hbm_to_vmem [thread:$0]  %s401_s0, 64, %s17_s10, [#allocation3]  }
  0x13   :  { %s287_s25 = scalar_lea.hbm %s402_s1, 1280 }
  0x14   :  { %p288_p8 = scmp.ne.s32.totalorder %s402_s1, %s287_s25  ;;  %p291_p9 = scmp.lt.u32.totalorder %s287_s25, %s402_s1 }
  0x16   :  { %p293_p10 = pnand %p291_p9, %p288_p8 }
  0x18   :  { %296 = shalt.err (!%p293_p10)
}
  0x19   :  { %s297_s30 = scalar_lea.vmem %s358_s12, 1280  ;;  %p302_p12 = scmp.lt.s32.totalorder %s358_s12, %s358_s12 }
  0x1a   :  { %p298_p11 = scmp.ne.s32.totalorder %s358_s12, %s297_s30  ;;  %p303_p13 = scmp.lt.s32.totalorder %s297_s30, %s297_s30 }
  0x1c   :  { %p304_p0 = por %p303_p13, %p302_p12 }
  0x1e   :  { %p305_p1 = pnand %p304_p0, %p298_p11 }
  0x20   :  { %308 = shalt.err (!%p305_p1)
}
  0x21   :  { %s339_s0 = smov 256   ;;  %s340_s3 = smov 16  }
  0x22   :  { %31 = dma.hbm_to_vmem [thread:$0]  %s402_s1, 1280, %s358_s12, [#allocation6], %s339_s0, %s339_s0, %s340_s3  }
  0x23   :  { %331 = dma.done.wait [#allocation3], 64  }
  0x24   :  { %332 = vsyncadd [#allocation3], 4294967232 }
  0x25   :  { %333 = dma.done.wait [#allocation6], 1280  }
  0x26   :  { %334 = vsyncadd [#allocation6], 4294966016  ;;  %v341_v0 = vmov 0   ;;  %v249_v1 = vld [vmem:[#allocation5 + $0x4] ss:$16 sps:$4 sm:$0xff]   ;;  %vm104_vm0 = vcmask 1041408  }
  0x27   :  { %149 = vmatprep.mubr.bf16.mxu0 %v341_v0  ;;  %190 = vmatprep.mubr.bf16.mxu1 %v341_v0  ;;  %v251_v2 = vld [vmem:[#allocation5 + $0xc] ss:$16 sps:$4 sm:$0xff]   ;;  %v253_v3 = vld [vmem:[#allocation5] ss:$16 sps:$4 sm:$0xff]   ;;  %v254_v4 = vld [vmem:[#allocation5 + $0x8] ss:$16 sps:$4 sm:$0xff]  }
  0x28   :  { %117 = vmatprep.subr.bf16.mxu0 %v249_v1  ;;  %158 = vmatprep.subr.bf16.mxu1 %v251_v2  ;;  %v255_v5 = vld [vmem:[#allocation5 + $0x24] ss:$16 sps:$4 sm:$0xff]   ;;  %v257_v6 = vld [vmem:[#allocation5 + $0x2c] ss:$16 sps:$4 sm:$0xff]   ;;  %v259_v7 = vld [vmem:[#allocation5 + $0x20] ss:$16 sps:$4 sm:$0xff]  }
  0x29   :  { %118 = vmatpush1.bf16.msra.mxu0 %v253_v3  ;;  %159 = vmatpush1.bf16.msra.mxu1 %v254_v4  ;;  %v260_v8 = vld [vmem:[#allocation5 + $0x28] ss:$16 sps:$4 sm:$0xff]   ;;  %v48_v9 = vld [vmem:[#allocation5 + $0x40] sm:$0x33]  ;;  %v39_v17 = vld [vmem:[#allocation2] sm:$0xf] }
  0x2a   :  { %119 = vmatprep.subr.bf16.mxu0 %v255_v5  ;;  %v49_v10 = vld [vmem:[#allocation5 + $0x48] sm:$0x33]  ;;  %160 = vmatprep.subr.bf16.mxu1 %v257_v6  ;;  %v236_v11 = vcombine.high %v48_v9, %v48_v9  ;;  %v235_v13 = vcombine.low %v48_v9, %v48_v9  ;;  %vm100_vm1 = vcmask 293888   ;;  %s342_s1 = smov [#allocation7]  }
  0x2b   :  { %v238_v12 = vcombine.high %v49_v10, %v49_v10  ;;  %v237_v14 = vcombine.low %v49_v10, %v49_v10  ;;  %s217_s6 = sshll.u32 %s342_s1, 4  ;;  %s218_s6 = int_to_ptr.vmem [resolvable:$true] %s217_s6 }
  0x2c   :  { %v106_v15 = vsel %vm104_vm0, %v235_v13, 0  ;;  %s309_s7 = scalar_lea.vmem %s218_s6, 512  ;;  %p314_p3 = scmp.lt.s32.totalorder %s218_s6, %s218_s6 }
  0x2d   :  { %120 = vmatpush1.bf16.msra.mxu0 %v259_v7  ;;  %161 = vmatpush1.bf16.msra.mxu1 %v260_v8  ;;  %v112_v16 = vsel %vm104_vm0, %v237_v14, 0  ;;  %p310_p2 = scmp.ne.s32.totalorder %s218_s6, %s309_s7  ;;  %p315_p4 = scmp.lt.s32.totalorder %s309_s7, %s309_s7 }
  0x2e   :  { %239 = vmatprep.subr.msk.bf16.mxu0 %vm104_vm0, %v236_v11  ;;  %241 = vmatprep.subr.msk.bf16.mxu1 %vm104_vm0, %v238_v12 }
  0x2f   :  { %p316_p5 = por %p315_p4, %p314_p3 }
  0x31   :  { %122 = vmatpush1.bf16.msra.mxu0 %v106_v15  ;;  %163 = vmatpush1.bf16.msra.mxu1 %v112_v16  ;;  %p317_p6 = pnand %p316_p5, %p310_p2 }
  0x34   :  { %240 = vmatmul.mubr.msk.bf16.vlgmr.msra.gmra.mrb[0].mxu0 %vm100_vm1, %v39_v17  ;;  %242 = vmatmul.mubr.msk.bf16.vlgmr.msra.gmra.mrb[0].mxu1 %vm100_vm1, %v39_v17 }
 0x107   :  { %v151_v18 = vpop.f32.mrb[0].mxu0  ;;  %v192_v19 = vpop.f32.mrb[0].mxu1 }
 0x108   :  { %v199_v20 = vmul.f32 0.2, %v151_v18  ;;  %v201_v21 = vmul.f32 0.2, %v192_v19  ;;  %v153_v22 = vpop.f32.mrb[1].mxu0  ;;  %v194_v23 = vpop.f32.mrb[1].mxu1 }
 0x109   :  { %v200_v24 = vmul.f32 0.2, %v153_v22  ;;  %v202_v25 = vmul.f32 0.2, %v194_v23  ;;  %v155_v26 = vpop.f32.mrb[2].mxu0  ;;  %v196_v27 = vpop.f32.mrb[2].mxu1 }
 0x10a   :  { %v203_v28 = vmax.f32 %v151_v18, %v199_v20  ;;  %v205_v29 = vmax.f32 %v192_v19, %v201_v21  ;;  %v156_v30 = vpop.f32.mrb[3].mxu0  ;;  %v197_v31 = vpop.f32.mrb[3].mxu1 }
 0x10b   :  { %v204_v32 = vmax.f32 %v153_v22, %v200_v24  ;;  %v206_v33 = vmax.f32 %v194_v23, %v202_v25 }
 0x10c   :  { %207 = vst [vmem:[#allocation7] sm:$0xff] %v203_v28  ;;  %209 = vst [vmem:[#allocation7 + $0x10] sm:$0xff] %v205_v29 }
 0x10d   :  { %208 = vst [vmem:[#allocation7 + $0x8] sm:$0xff] %v204_v32  ;;  %210 = vst [vmem:[#allocation7 + $0x18] sm:$0xff] %v206_v33 }
 0x10e   :  { %320 = shalt.err (!%p317_p6)
}
 0x10f   :  { %s321_s10 = scalar_lea.hbm %s403_s2, 512 }
 0x110   :  { %p322_p7 = scmp.ne.s32.totalorder %s403_s2, %s321_s10  ;;  %p325_p8 = scmp.lt.u32.totalorder %s321_s10, %s403_s2 }
 0x112   :  { %p327_p9 = pnand %p325_p8, %p322_p7 }
 0x114   :  { %330 = shalt.err (!%p327_p9)
}
 0x115   :  { %220 = dma.vmem_to_hbm [thread:$0]  %s218_s6, 512, %s403_s2, [#allocation4]  }
 0x116   :  { %335 = dma.done.wait [#allocation4], 512  }
 0x117   :  { %336 = vsyncadd [#allocation4], 4294966784 }
 0x118   :  { %224 = vsyncpa [#allocation3], 1 }
 0x119   :  { %225 = vsyncpa [#allocation6], 1 }
 0x11a   :  { %226 = vsyncpa [#allocation4], 1 }

</bundles_post_ra>
